<compile_context>
chip_gen: v5e
topology: v5e:2x2
jax: 0.10.0
libtpu: 0.0.40
codegen_flags: <defaults>
</compile_context>

<pallas_src>
import math
import functools

import jax
import jax.numpy as jnp
from jax.experimental import pallas as pl
from jax.experimental.pallas import tpu as pltpu


_TARGET_BLOCK_BYTES = 4 * 1024 * 1024   # ~4 MiB/block: >=85% HBM roofline, v7x-safe


def _local_flat_index_u32(shape):
    """Row-major flat index of every element of a block (uint32). 2 iotas + 1 mul + 1 add
    for a 2-D block; size-1 dims are skipped."""
    strides = pl.strides_from_shape(shape)
    idx = None
    for ax, stride in enumerate(strides):
        if shape[ax] == 1:
            continue
        term = jax.lax.broadcasted_iota(jnp.uint32, shape, ax)
        if stride != 1:
            term = term * jnp.uint32(stride)
        idx = term if idx is None else idx + term
    if idx is None:
        idx = jnp.zeros(shape, jnp.uint32)
    return idx


def _pe_add_dropout_kernel(seed_ref, x_ref, pe_ref, o_ref, *, p):
    """out = dropout(x + pe); pe broadcasts over the leading (batch) block dim."""
    y = x_ref[...] + pe_ref[...]                                   # VPU broadcasted add

    if p > 0.0:
        # Per-block scalar seed (scalar ALU, free): folds all global offsets so the
        # vector path only hashes the small local index (no uint32-wrap issue).
        blk = pl.program_id(0) * pl.num_programs(1) + pl.program_id(1)
        seed_mix = (seed_ref[0].astype(jnp.uint32)
                    + blk.astype(jnp.uint32) * jnp.uint32(0x9E3779B1))
        # Cheap 2-round counter hash (~13 VPU ops/elem): mul, xorshift, mul, xorshift.
        h = _local_flat_index_u32(o_ref.shape) + seed_mix
        h = h * jnp.uint32(0x9E3779B9)
        h = h ^ (h >> 16)
        h = h * jnp.uint32(0x85EBCA6B)
        h = h ^ (h >> 13)
        # keep with probability 1 - p  (unsigned compare against integer threshold)
        thr = jnp.uint32(min(int(round(p * 4294967296.0)), 4294967295))
        keep = h >= thr
        inv_keep = jnp.asarray(1.0 / (1.0 - p), dtype=y.dtype)
        y = jnp.where(keep, y * inv_keep, jnp.zeros((), dtype=y.dtype))

    o_ref[...] = y.astype(o_ref.dtype)


def make_pe_table(d_model, max_len=10, dtype=jnp.float32):
    """Deterministic sin/cos positional-encoding table, shape (1, max_len, d_model)."""
    position = jnp.arange(0, max_len, dtype=jnp.float32)[:, None]             # (L, 1)
    div_term = jnp.exp(jnp.arange(0, d_model, 2, dtype=jnp.float32)
                       * (-(math.log(10000.0) / d_model)))                    # (ceil(D/2),)
    pe = jnp.zeros((max_len, d_model), dtype=jnp.float32)
    pe = pe.at[:, 0::2].set(jnp.sin(position * div_term))
    pe = pe.at[:, 1::2].set(jnp.cos(position * div_term[: d_model // 2]))     # odd-D safe
    return pe[None].astype(dtype)                                             # (1, L, D)


def _sublane_multiple(dtype):
    """Sublane packing multiple: 8 (f32), 16 (bf16/f16), 32 (int8/fp8)."""
    return max(8, 32 // jnp.dtype(dtype).itemsize)


def _vmem_limit_bytes():
    """Scoped-VMEM limit derived from the actual chip generation."""
    try:
        cap = int(pltpu.get_tpu_info().vmem_capacity_bytes)
    except Exception:
        cap = 128 * 1024 * 1024
    return int(min(64 * 1024 * 1024, max(16 * 1024 * 1024, cap // 2)))


def _pick_col_tile(n, tb, itemsize, want_even_extent):
    """Largest 128-multiple dividing n with block bytes <= target; prefers an even
    number of column tiles (keeps both v7x TensorCores busy when batch extent is 1)."""
    assert n % 128 == 0
    cap = max(128, _TARGET_BLOCK_BYTES // (itemsize * max(tb, 1)))
    cands = [t for t in range(128, min(n, cap) + 1, 128) if n % t == 0]
    if not cands:
        cands = [128]
    best = cands[-1]
    if want_even_extent:
        even = [t for t in cands if (n // t) % 2 == 0]
        if even:
            best = even[-1]
        elif (n // best) < 2:
            multi = [t for t in cands if (n // t) >= 2]
            if multi:
                best = multi[-1]
    return best


def _pick_seq_tile(s, d, itemsize, sub):
    """Sequence tile for the non-128-aligned fallback: bounded, sublane-aligned."""
    cap = max(1, _TARGET_BLOCK_BYTES // (itemsize * max(d, 1)))
    if s <= cap:
        return s
    for step in (sub, 8):
        cands = [t for t in range(step, min(s, cap) + 1, step) if s % t == 0]
        if cands:
            return cands[-1]
    return s   # TODO(synk): S with no 8-aligned divisor under the VMEM cap -> one big block


def positional_encoding(x, pe, *, p=0.0, seed=0):
    """x: (B, S, D); pe: (1, max_len, D). Returns dropout(x + pe[:, :S, :])."""
    assert 0.0 <= float(p) < 1.0, "dropout p must be in [0, 1)"
    B, S, D = x.shape
    assert pe.shape[1] >= S and pe.shape[2] == D
    N = S * D
    itemsize = jnp.dtype(x.dtype).itemsize
    sub = _sublane_multiple(x.dtype)
    pe_s = pe[:, :S, :].astype(x.dtype)

    kernel = functools.partial(_pe_add_dropout_kernel, p=float(p))
    seed_arr = jnp.array([seed], dtype=jnp.int32)
    cparams = pltpu.CompilerParams(
        dimension_semantics=("parallel", "parallel"),
        vmem_limit_bytes=_vmem_limit_bytes(),
    )
    cost = pl.CostEstimate(
        flops=B * N * (2 if p > 0.0 else 1),
        transcendentals=0,
        bytes_accessed=(2 * B * N + N) * itemsize,
    )

    if N % 128 == 0:
        # Lane-dense path: flatten (S, D) so the lane dim is a big 128-multiple.
        x2 = x.reshape(B, N)
        pe2 = pe_s.reshape(1, N)
        TB = sub if (B % sub == 0) else B                 # dtype-aware sublane packing
        TC = _pick_col_tile(N, TB, itemsize,
                            want_even_extent=((B // TB) % 2 == 1))
        grid = (N // TC, B // TB)                         # batch innermost -> pe DMA reused
        grid_spec = pltpu.PrefetchScalarGridSpec(
            num_scalar_prefetch=1,
            grid=grid,
            in_specs=[
                pl.BlockSpec((TB, TC), lambda c, b, seed_ref: (b, c)),   # x
                pl.BlockSpec((1, TC), lambda c, b, seed_ref: (0, c)),    # pe (batch-invariant)
            ],
            out_specs=pl.BlockSpec((TB, TC), lambda c, b, seed_ref: (b, c)),
        )
        out2 = pl.pallas_call(
            kernel,
            out_shape=jax.ShapeDtypeStruct((B, N), x.dtype),
            grid_spec=grid_spec,
            compiler_params=cparams,
            cost_estimate=cost,
        )(seed_arr, x2, pe2)
        return out2.reshape(B, S, D)

    # Fallback: S*D not 128-aligned -> tile over S with D as the (masked) lane dim.
    TS = _pick_seq_tile(S, D, itemsize, sub)
    grid = (S // TS, B)                                   # batch innermost -> pe DMA reused
    grid_spec = pltpu.PrefetchScalarGridSpec(
        num_scalar_prefetch=1,
        grid=grid,
        in_specs=[
            pl.BlockSpec((1, TS, D), lambda s, b, seed_ref: (b, s, 0)),   # x
            pl.BlockSpec((1, TS, D), lambda s, b, seed_ref: (0, s, 0)),   # pe
        ],
        out_specs=pl.BlockSpec((1, TS, D), lambda s, b, seed_ref: (b, s, 0)),
    )
    return pl.pallas_call(
        kernel,
        out_shape=jax.ShapeDtypeStruct((B, S, D), x.dtype),
        grid_spec=grid_spec,
        compiler_params=cparams,
        cost_estimate=cost,
    )(seed_arr, x, pe_s)


if __name__ == "__main__":
    # Small shapes consistent with the module: batch=2, seq=8 (<= max_len=10), d_model=32.
    B, S, D = 2, 8, 32
    max_len = 10
    dropout_p = 0.1

    key = jax.random.PRNGKey(0)
    x = jax.random.normal(key, (B, S, D), dtype=jnp.float32)
    pe = make_pe_table(D, max_len=max_len)

    ref = x + pe[:, :S, :]

    # 1) No-dropout path (eval-mode semantics): must match x + pe exactly.
    out_eval = jax.block_until_ready(positional_encoding(x, pe, p=0.0))
    assert out_eval.shape == (B, S, D)
    assert jnp.allclose(out_eval, ref, atol=1e-6), "eval-mode mismatch"

    # 2) Dropout path (training semantics): every element is either 0 or ref/(1-p).
    out_train = jax.block_until_ready(positional_encoding(x, pe, p=dropout_p, seed=1234))
    assert out_train.shape == (B, S, D)
    scaled = ref / (1.0 - dropout_p)
    kept_match = jnp.isclose(out_train, scaled, atol=1e-5, rtol=1e-5)
    drop_match = jnp.isclose(out_train, 0.0, atol=1e-6)
    assert bool(jnp.all(kept_match | drop_match)), "dropout values not in {0, ref/(1-p)}"
    n_total = B * S * D
    n_dropped = int(jnp.sum(jnp.logical_and(drop_match, jnp.logical_not(kept_match))))
    assert 0 < n_dropped < int(0.3 * n_total), f"dropout rate looks off: {n_dropped}/{n_total}"

    print("KERNEL_OK")
</pallas_src>

<mosaic_0001>
module attributes {stable_mosaic.version = 11 : i64} {
  func.func @_pe_add_dropout_kernel(%arg0: i32, %arg1: i32, %arg2: memref<1xi32, #tpu.memory_space<smem>>, %arg3: memref<2x128xf32, #tpu.memory_space<vmem>>, %arg4: memref<1x128xf32, #tpu.memory_space<vmem>>, %arg5: memref<2x128xf32, #tpu.memory_space<vmem>>) attributes {dimension_semantics = [#tpu.dimension_semantics<parallel>, #tpu.dimension_semantics<parallel>], iteration_bounds = array<i64: 2, 1>, scalar_prefetch = 1 : i64, scratch_operands = 0 : i64, tpu.core_type = #tpu.core_type<tc>, window_params = [{transform_indices = @transform_0, window_bounds = array<i64: 2, 128>}, {transform_indices = @transform_1, window_bounds = array<i64: 1, 128>}, {transform_indices = @transform_2, window_bounds = array<i64: 2, 128>}]} {
    %c0 = arith.constant 0 : index
    %c0_0 = arith.constant 0 : index
    %0 = vector.load %arg3[%c0, %c0_0] : memref<2x128xf32, #tpu.memory_space<vmem>>, vector<2x128xf32>
    %c0_1 = arith.constant 0 : index
    %c0_2 = arith.constant 0 : index
    %1 = vector.load %arg4[%c0_1, %c0_2] : memref<1x128xf32, #tpu.memory_space<vmem>>, vector<1x128xf32>
    %2 = vector.broadcast %1 : vector<1x128xf32> to vector<2x128xf32>
    %3 = arith.addf %0, %2 : vector<2x128xf32>
    %c0_3 = arith.constant 0 : index
    %c0_4 = arith.constant 0 : index
    %4 = vector.load %arg5[%c0_3, %c0_4] : memref<2x128xf32, #tpu.memory_space<vmem>>, vector<2x128xf32>
    tpu.vector_store %arg5[%c0_3, %c0_4], %3 {strides = array<i32>} : memref<2x128xf32, #tpu.memory_space<vmem>>, vector<2x128xf32>,
    return
  }
  func.func @transform_0(%arg0: i32, %arg1: i32, %arg2: memref<1xi32, #tpu.memory_space<smem>>) -> (i32, i32) {
    %c0_i32 = arith.constant 0 : i32
    return %arg1, %arg0 : i32, i32
  }
  func.func @transform_1(%arg0: i32, %arg1: i32, %arg2: memref<1xi32, #tpu.memory_space<smem>>) -> (i32, i32) {
    %c0_i32 = arith.constant 0 : i32
    %c0_i32_0 = arith.constant 0 : i32
    return %c0_i32, %arg0 : i32, i32
  }
  func.func @transform_2(%arg0: i32, %arg1: i32, %arg2: memref<1xi32, #tpu.memory_space<smem>>) -> (i32, i32) {
    %c0_i32 = arith.constant 0 : i32
    return %arg1, %arg0 : i32, i32
  }
}

</mosaic_0001>

<bundles_post_ra>
// kernel: tpu_custom_call.1
= control target key start
LH: loop header
LB: loop body
LE: loop exit
PB: predicated region body
PF: predicated region fallthrough
CT: control target
= control target key end

     0   :  { %9 = vsyncpa [#allocation5], 0  ;;  %s646_s0 = inlined_call_operand.<no memory space> [shape: s32[1], index: 0, kind: input, shape index: {}]   ;;  %s647_s1 = inlined_call_operand.hbm [shape: f32[2,256], index: 1, kind: input, shape index: {}]   ;;  %s648_s2 = inlined_call_operand.vmem [shape: f32[1,256], index: 2, kind: input, shape index: {}]   ;;  %s649_s3 = inlined_call_operand.hbm [shape: f32[2,256], index: 3, kind: output, shape index: {}]  }
   0x1   :  { %11 = vsyncpa [#allocation5 + $0x1], 0 }
   0x2   :  { %12 = vsyncpa [#allocation6], 0 }
   0x3   :  { %14 = vsyncpa [#allocation6 + $0x1], 0  ;;  %s521_s12 = smov 0   ;;  %s523_s13 = smov 0  }
   0x4   :  { %s525_s14 = smov 0   ;;  %s527_s0 = smov 0  }
   0x5   :  { %s529_s15 = smov 0   ;;  %s531_s16 = smov 0  }
   0x6 LB: > { %s311_s17 = sadd.s32 4294967295, %s499_s16   ;;  %s312_s18 = sadd.s32 4294967294, %s499_s16   ;;  %s499_s16 = sphi %s531_s16, %s20_s16   ;;  %s495_s15 = sphi %s529_s15, %s658_s15   ;;  %s491_s0 = sphi %s527_s0, %s657_s0   ;;  %s487_s14 = sphi %s525_s14, %s656_s14   ;;  %s483_s13 = sphi %s523_s13, %s655_s13   ;;  %s479_s12 = sphi %s521_s12, %s654_s12  }
   0x7   : > { %s32_s19 = sadd.s32 1, %s495_s15  ;;  %s41_s20 = sadd.s32 1, %s487_s14 }
   0x8   : > { %p34_p0 = scmp.ge.s32.totalorder %s32_s19, 2  ;;  %p48_p1 = scmp.ne.s32.totalorder %s487_s14, %s483_s13 }
   0x9   : > { %p49_p2 = scmp.eq.s32.totalorder %s499_s16, 0  ;;  %p54_p3 = scmp.ne.s32.totalorder %s483_s13, %s479_s12 }
   0xa   : > { %s660_s19 = smov (%p34_p0, %s32_s19), 0  ;;  %p55_p5 = scmp.eq.s32.totalorder %s311_s17, 0 }
   0xb   : > { %p562_p4 = por %p49_p2, %p48_p1  ;;  %s37_s22 = ssub.s32 %s495_s15, %s660_s19 }
   0xc   : > { %p106_p6 = scmp.eq.s32.totalorder %s311_s17, 1  ;;  %p39_p7 = scmp.eq.s32.totalorder %s37_s22, 0 }
   0xd   : > { %p568_p8 = por %p55_p5, %p54_p3  ;;  %p112_p10 = scmp.eq.s32.totalorder %s312_s18, 1 }
   0xe   : > { %p572_p9 = por %p106_p6, %p48_p1  ;;  %p314_p12 = scmp.ge.s32.totalorder %s499_s16, 2 }
   0xf   : > { %s577_s25 = scalar_select %p39_p7, %s487_s14, %s41_s20  }
  0x10   : > { %p579_p11 = por %p112_p10, %p54_p3  ;;  %p336_p13 = scmp.lt.s32.totalorder %s499_s16, 2 }
  0x11   : > { %s132_s27 = sand.u32 1, %s487_s14   ;;  %s316_s29 = sshll.u32 %s495_s15, 1 }
  0x12   : > { %s315_s28 = sshll.u32 %s132_s27, 1  ;;  %s142_s5 = scalar_lea.hbm %s647_s1, %s316_s29 }
  0x13   : > { %s136_s6 = scalar_lea.vmem [#allocation4], %s315_s28  ;;  %s144_s8 = sshll.u32 %s142_s5, 4  ;;  %s145_s8 = int_to_ptr.hbm [resolvable:$true] %s144_s8 }
  0x14   : > { %s146_s7 = sshll.u32 %s136_s6, 4  ;;  %p329_p0 = pnand %p336_p13, %p562_p4  ;;  %s147_s7 = int_to_ptr.vmem [resolvable:$true] %s146_s7 }
  0x15   : > { %p317_p1 = scmp.ge.s32.totalorder %s499_s16, 1  ;;  %p157_p2 = scmp.lt.s32.totalorder %s499_s16, 3 }
  0x16   : > { %s133_s9 = scalar_lea.sflag [#allocation5], %s132_s27 }
  0x17   : > { %331 = dma.hbm_to_vmem [thread:$0]  (!%p329_p0), %s145_s8, 32, %s147_s7, %s133_s9  }
  0x18   : > { %p158_p3 = pnand %p317_p1, %p157_p2 }
  0x19   : > { %s595_s10 = sand.u32 (!%p158_p3), 1, %s483_s13  }
  0x1a   : > { %161 = sbr.rel (%p158_p3) target bundleno = 49 (0x31), region = 28  ;;  %s318_s11 = sshll.u32 (!%p158_p3), %s595_s10, 1 }
  0x1b   : > { %s164_s17 = scalar_lea.sflag (!%p158_p3), [#allocation5], %s595_s10  ;;  %s167_s18 = scalar_lea.vmem (!%p158_p3), [#allocation4], %s318_s11 }
  0x1f   : > { %470 = dma.done.wait (%p568_p8), %s164_s17, 32  }
  0x20   : > { %472 = vsyncadd (%p568_p8), %s164_s17, 4294967264  ;;  %p192_p4 = scmp.lt.s32.totalorder %s491_s0, 1  ;;  %s321_s21 = sshll.u32 %s491_s0, 1  ;;  %v195_v0 = vld [vmem:[%s167_s18] sm:$0x3] }
  0x21   : > { %s215_s4 = scalar_lea.hbm %s649_s3, %s321_s21  ;;  %s191_s5 = scalar_lea.vmem [#allocation7], %s318_s11 }
  0x22   : > { %s193_s20 = scalar_select %p192_p4, %s491_s0, 1 }
  0x23   : > { %s217_s6 = sshll.u32 %s191_s5, 4  ;;  %s219_s23 = sshll.u32 %s215_s4, 4  ;;  %s218_s6 = int_to_ptr.vmem [resolvable:$true] %s217_s6  ;;  %s220_s23 = int_to_ptr.hbm [resolvable:$true] %s219_s23 }
  0x24   : > { %s194_s28 = scalar_lea.vmem %s648_s2, %s193_s20  ;;  %s203_s7 = scalar_lea.sflag [#allocation6], %s595_s10 }
  0x25   : > { %v386_v1 = vld [vmem:[%s194_s28] ss:$0 sm:$0xff]  ;;  %s431_s0 = sshra.s32 %s220_s23, 4  ;;  %s437_s11 = scalar_lea.hbm %s649_s3, 4  ;;  %s432_s0 = int_to_ptr.hbm [resolvable:$true] %s431_s0 }
  0x26   : > { %v200_v2 = vadd.f32 %v386_v1, %v195_v0  ;;  %s433_s8 = scalar_lea.hbm %s432_s0, 2  ;;  %p438_p8 = scmp.lt.s32.totalorder %s432_s0, %s649_s3 }
  0x27   : > { %p434_p5 = scmp.ne.s32.totalorder %s432_s0, %s433_s8  ;;  %p439_p10 = scmp.lt.s32.totalorder %s437_s11, %s433_s8 }
  0x28   : > { %201 = vst [vmem:[%s191_s5] sm:$0x3] %v200_v2 }
  0x29   : > { %p435_p6 = pnand %p434_p5, %p572_p9  ;;  %p440_p13 = por %p439_p10, %p438_p8 }
  0x2b   : > { %p436_p7 = pneg %p435_p6 }
  0x2d   : > { %p441_p0 = pnand %p440_p13, %p436_p7 }
  0x2f   : > { %444 = shalt.err (!%p441_p0)
}
  0x30   : > { %326 = dma.vmem_to_hbm [thread:$0]  (%p572_p9), %s218_s6, 32, %s220_s23, %s203_s7  }
  0x31 PF: > { %s231_s10 = sand.u32 1, %s479_s12   ;;  %p333_p1 = pnand %p314_p12, %p579_p11 }
  0x32   : > { %s232_s18 = scalar_lea.sflag [#allocation6], %s231_s10 }
  0x33   : > { %p334_p2 = pneg %p333_p1 }
  0x35   : > { %474 = dma.done.wait (%p334_p2), %s232_s18, 32  }
  0x36   : > { %476 = vsyncadd (%p334_p2), %s232_s18, 4294967264  ;;  %s20_s16 = sadd.s32 1, %s499_s16   ;;  %s654_s12 = smov %s483_s13 }
  0x37   : > { %p17_p3 = scmp.ge.s32.totalorder %s20_s16, 4   ;;  %s655_s13 = smov %s487_s14 }
  0x38   : > { %s656_s14 = smov %s577_s25  ;;  %s657_s0 = smov %s495_s15 }
  0x39   : > { %s658_s15 = smov %s660_s19  ;;  %19 = sbr.rel (!%p17_p3) target bundleno = 6 (0x6), region = 76 }
  0x3e   :  { %238 = vsyncpa [#allocation5], 1 }
  0x3f   :  { %240 = vsyncpa [#allocation5 + $0x1], 1 }
  0x40   :  { %241 = vsyncpa [#allocation6], 1 }
  0x41   :  { %243 = vsyncpa [#allocation6 + $0x1], 1 }

</bundles_post_ra>
